<compile_context>
chip_gen: v7x
topology: tpu7x:2x2x1
jax: 0.10.0
libtpu: 0.0.40
codegen_flags: <defaults>
</compile_context>

<pallas_src>
import math

import numpy as np
import jax
import jax.numpy as jnp
from jax import lax
from jax.experimental import pallas as pl
from jax.experimental.pallas import tpu as pltpu

_LANES = 128
_SUBLANES = 8
_MAX_PERIOD_ROWS = 4096     # resident target tile cap (rows): 4096*128*4B = 2 MiB
_CHUNK_ROWS = 1024          # in-kernel strip-mine chunk (~512 KiB f32 temporaries)


def _lcm(a, b):
    return a * b // math.gcd(a, b)


def _is_trailing_broadcast(t_shape, x_shape):
    """True iff broadcasting target against x just tiles target.ravel()
    periodically along x.ravel() (target matches trailing dims of x)."""
    ts = list(t_shape)
    while ts and ts[0] == 1:
        ts.pop(0)
    if len(ts) > len(x_shape):
        return False
    if not ts:
        return True
    return ts == list(x_shape)[len(x_shape) - len(ts):]


def _num_core_splits():
    """2-way grid split only on 2-TensorCore chips (v7x); 1 elsewhere."""
    try:
        kind = jax.devices()[0].device_kind.lower()
    except Exception:
        return 1
    return 2 if ("v7" in kind or "7x" in kind) else 1


def _make_loss_kernel(*, rt, chunk, g, bpc, n_blocks, last_rows, periodic,
                      gate_dup):
    """All arguments are static Python values baked into the kernel."""
    n_chunks = rt // chunk
    partial_last = last_rows < rt

    def accum_block(x_ref, t_ref, o_ref, masked):
        if periodic:
            # small (g,128) resident tile -> one block-chunk-sized broadcast,
            # hoisted out of the chunk loop (broadcast_in_dim is not CSE'd).
            t_small = t_ref[...].astype(jnp.float32)
            t_chunk = jnp.broadcast_to(
                t_small[None], (chunk // g, g, _LANES)).reshape(chunk, _LANES)
        for ci in range(n_chunks):                       # static unroll
            r0 = ci * chunk
            if masked and r0 >= last_rows:
                break                                    # fully-invalid chunks
            xs = x_ref[pl.ds(r0, chunk), :].astype(jnp.float32)
            if periodic:
                d = xs - t_chunk
            else:
                d = xs - t_ref[pl.ds(r0, chunk), :].astype(jnp.float32)
            if masked and (r0 + chunk > last_rows):
                # only the single boundary chunk of the single partial block;
                # mask BEFORE d*d so stale-VMEM garbage never propagates.
                rows = lax.broadcasted_iota(jnp.int32, (chunk, _LANES), 0) + r0
                d = jnp.where(rows < last_rows, d, 0.0)
            # (chunk,128) -> (8,128): pure VPU adds into the VMEM-resident
            # output block; the scalar reduce happens once, in the wrapper.
            o_ref[...] += (d * d + jnp.abs(d)).reshape(
                -1, _SUBLANES, _LANES).sum(axis=0)

    def kernel(x_ref, t_ref, o_ref):
        c = pl.program_id(0)          # core-split axis ("parallel")
        j = pl.program_id(1)          # streaming axis   ("arbitrary")
        blk = c * bpc + j             # logical (unclamped) block id

        @pl.when(j == 0)
        def _init():                  # fresh accumulator per core slice
            o_ref[...] = jnp.zeros_like(o_ref)

        if partial_last:
            @pl.when(blk < n_blocks - 1)
            def _full():              # hot path: no masking at all
                accum_block(x_ref, t_ref, o_ref, masked=False)

            @pl.when(blk == n_blocks - 1)
            def _tail():              # the one partial block
                accum_block(x_ref, t_ref, o_ref, masked=True)
            # blk >= n_blocks (duplicated clamped blocks) fall through: skipped.
        elif gate_dup:
            @pl.when(blk < n_blocks)
            def _body():
                accum_block(x_ref, t_ref, o_ref, masked=False)
        else:
            accum_block(x_ref, t_ref, o_ref, masked=False)

    return kernel


def custom_loss(input_arr, target_arr, weight=1.0, *, row_tile=8192):
    """Pallas TPU implementation of CustomLoss.forward."""
    input_arr = jnp.asarray(input_arr)
    target_arr = jnp.asarray(target_arr)
    n = int(input_arr.size)
    scale = jnp.float32(float(weight) / float(n))

    flat_x = input_arr.reshape(-1)
    m_rows = n // _LANES                 # full 128-lane rows fed to the kernel
    rem = n - m_rows * _LANES            # <=127 trailing elements (plain JAX)

    # sublane packing granularity for the input dtype (8 f32 / 16 bf16 / 32 i8)
    base = _SUBLANES * max(1, 4 // input_arr.dtype.itemsize)

    # ---- tiny-input fallback: not worth a kernel launch ----------------------
    if m_rows < base:
        d = (flat_x.astype(jnp.float32)
             - jnp.broadcast_to(target_arr, input_arr.shape)
                  .reshape(-1).astype(jnp.float32))
        return (scale * jnp.sum(d * d + jnp.abs(d))).astype(jnp.float32)

    # ---- resident-target (periodic) geometry ---------------------------------
    periodic = _is_trailing_broadcast(target_arr.shape, input_arr.shape)
    p = int(target_arr.size)
    if periodic and p != n:
        q = p // math.gcd(p, _LANES)
        g = _lcm(base, q)                 # t-tile rows; guarantees p | g*128
        if g > min(_MAX_PERIOD_ROWS, m_rows):
            periodic, g = False, base     # awkward period -> stream the target
    else:
        periodic, g = False, base

    # ---- block geometry: rt rows per block, strip-mined into `chunk` rows ----
    max_rt = (m_rows // g) * g            # largest g-multiple <= m_rows
    rt = min(max(row_tile, g), max_rt)
    rt = max(g, (rt // g) * g)
    chunk = min(rt, max(g, (_CHUNK_ROWS // g) * g))
    rt = max(chunk, (rt // chunk) * chunk)          # chunk | rt, rt <= m_rows

    n_blocks = pl.cdiv(m_rows, rt)
    last_rows = m_rows - (n_blocks - 1) * rt        # valid rows of last block

    n_splits = _num_core_splits()
    bpc = pl.cdiv(n_blocks, n_splits)               # blocks per core slice
    gate_dup = n_splits * bpc > n_blocks

    # ---- inputs fed to the kernel --------------------------------------------
    if rem:
        # TODO(synk): the prefix slice is one whole-array copy for ragged sizes;
        # avoiding it entirely would need a 1-D-layout kernel (not done here).
        x2d = flat_x[:m_rows * _LANES].reshape(m_rows, _LANES)
    else:
        x2d = flat_x.reshape(m_rows, _LANES)        # free bitcast reshape

    def x_map(c, j):
        # clamp keeps duplicated trailing blocks (odd n_blocks w/ 2-way split)
        # in bounds; pl.when in the kernel skips their contribution.
        return (jnp.minimum(c * bpc + j, n_blocks - 1), 0)

    x_spec = pl.BlockSpec((rt, _LANES), x_map)

    if periodic:
        # one small (g,128) periodic tile, fetched once and kept VMEM-resident
        t_arr = jnp.tile(target_arr.reshape(-1),
                         (g * _LANES) // p).reshape(g, _LANES)
        t_spec = pl.BlockSpec((g, _LANES), lambda c, j: (0, 0))
    else:
        # non-trailing broadcast / full-size target: materialize and stream
        t_full = jnp.broadcast_to(target_arr, input_arr.shape).reshape(-1)
        t_arr = (t_full[:m_rows * _LANES] if rem else t_full).reshape(
            m_rows, _LANES)
        t_spec = pl.BlockSpec((rt, _LANES), x_map)

    kernel = _make_loss_kernel(
        rt=rt, chunk=chunk, g=g, bpc=bpc, n_blocks=n_blocks,
        last_rows=last_rows, periodic=periodic, gate_dup=gate_dup)

    # ---- VMEM budget: double-buffered x + t, chunk temporaries, headroom -----
    x_bytes = 2 * rt * _LANES * x2d.dtype.itemsize
    t_bytes = 2 * t_arr.shape[0] * _LANES * t_arr.dtype.itemsize
    tmp_bytes = 6 * chunk * _LANES * 4
    vmem_limit = min(
        48 * 1024 * 1024,
        max(16 * 1024 * 1024,
            int(1.25 * (x_bytes + t_bytes + tmp_bytes)) + (2 << 20)))

    bytes_accessed = (x2d.size * x2d.dtype.itemsize
                      + t_arr.size * t_arr.dtype.itemsize
                      + n_splits * _SUBLANES * _LANES * 4)

    # TODO(synk): if profiling on v7x shows only one TensorCore streaming,
    # switch the leading axis to pltpu.CORE_PARALLEL (per-core out blocks are
    # already in place).
    partials = pl.pallas_call(
        kernel,
        out_shape=jax.ShapeDtypeStruct((n_splits * _SUBLANES, _LANES),
                                       jnp.float32),
        grid_spec=pltpu.PrefetchScalarGridSpec(
            num_scalar_prefetch=0,
            grid=(n_splits, bpc),
            in_specs=[x_spec, t_spec],
            out_specs=pl.BlockSpec((_SUBLANES, _LANES), lambda c, j: (c, 0)),
        ),
        compiler_params=pltpu.CompilerParams(
            dimension_semantics=("parallel", "arbitrary"),
            vmem_limit_bytes=vmem_limit),
        cost_estimate=pl.CostEstimate(
            flops=5 * n, transcendentals=0, bytes_accessed=bytes_accessed),
    )(x2d, t_arr)

    total = jnp.sum(partials)             # single tiny cross-lane reduce

    if rem:
        # <=127-element remainder handled in plain JAX (O(128) work).
        tail_x = flat_x[m_rows * _LANES:].astype(jnp.float32)
        if periodic:
            idx = np.arange(m_rows * _LANES, n) % p      # static gather indices
            tail_t = target_arr.reshape(-1)[idx].astype(jnp.float32)
        else:
            tail_t = jnp.broadcast_to(target_arr, input_arr.shape).reshape(
                -1)[m_rows * _LANES:].astype(jnp.float32)
        td = tail_x - tail_t
        total = total + jnp.sum(td * td + jnp.abs(td))

    return (scale * total).astype(jnp.float32)


def custom_loss_ref(input_arr, target_arr, weight=1.0):
    d = input_arr.astype(jnp.float32) - jnp.broadcast_to(
        jnp.asarray(target_arr), input_arr.shape).astype(jnp.float32)
    return weight * jnp.mean(d * d + jnp.abs(d))


if __name__ == "__main__":
    key = jax.random.PRNGKey(0)
    k1, k2 = jax.random.split(key)

    # NCHW input with a target broadcasting over the leading (B, C) dims —
    # mirrors the module's elementwise loss with a broadcastable target
    # (the spec broadcasts torch.ones(...) against the input).
    x = jax.random.normal(k1, (2, 4, 16, 16), dtype=jnp.float32)
    tgt = jnp.ones((16, 16), dtype=jnp.float32)
    loss = jax.block_until_ready(custom_loss(x, tgt, 1.0))
    ref = jax.block_until_ready(custom_loss_ref(x, tgt, 1.0))
    assert jnp.allclose(loss, ref, rtol=1e-5, atol=1e-5), (loss, ref)

    # Ragged (non-128-aligned) size with a scalar target: exercises the
    # partial-trailing-block mask, the plain-JAX tail, and the resident
    # scalar-target tile (period = 1).
    x2 = jax.random.normal(k2, (3, 5, 7, 11), dtype=jnp.float32)
    tgt2 = jnp.float32(0.5)
    loss2 = jax.block_until_ready(custom_loss(x2, tgt2, 2.0))
    ref2 = jax.block_until_ready(custom_loss_ref(x2, tgt2, 2.0))
    assert jnp.allclose(loss2, ref2, rtol=1e-5, atol=1e-5), (loss2, ref2)

    print("KERNEL_OK")
</pallas_src>

<mosaic_0001>
module attributes {stable_mosaic.version = 11 : i64} {
  func.func @kernel(%arg0: i32, %arg1: i32, %arg2: memref<16x128xf32, #tpu.memory_space<vmem>>, %arg3: memref<8x128xf32, #tpu.memory_space<vmem>>, %arg4: memref<8x128xf32, #tpu.memory_space<vmem>>) attributes {dimension_semantics = [#tpu.dimension_semantics<parallel>, #tpu.dimension_semantics<arbitrary>], iteration_bounds = array<i64: 1, 1>, scalar_prefetch = 0 : i64, scratch_operands = 0 : i64, tpu.core_type = #tpu.core_type<tc>, window_params = [{transform_indices = @transform_0, window_bounds = array<i64: 16, 128>}, {pipeline_mode = #tpu.pipeline_mode<synchronous>, transform_indices = @transform_1, window_bounds = array<i64: 8, 128>}, {transform_indices = @transform_2, window_bounds = array<i64: 8, 128>}]} {
    %c0_i32 = arith.constant 0 : i32
    %0 = arith.cmpi eq, %arg1, %c0_i32 : i32
    %1 = arith.extui %0 : i1 to i32
    %c0_i32_0 = arith.constant 0 : i32
    %2 = arith.cmpi ne, %1, %c0_i32_0 : i32
    scf.if %2 {
      %cst_8 = arith.constant 0.000000e+00 : f32
      %18 = vector.broadcast %cst_8 : f32 to vector<8x128xf32>
      %c0_9 = arith.constant 0 : index
      %c0_10 = arith.constant 0 : index
      %19 = vector.load %arg4[%c0_9, %c0_10] : memref<8x128xf32, #tpu.memory_space<vmem>>, vector<8x128xf32>
      tpu.vector_store %arg4[%c0_9, %c0_10], %18 {strides = array<i32>} : memref<8x128xf32, #tpu.memory_space<vmem>>, vector<8x128xf32>,
    } else {
    }
    %c0 = arith.constant 0 : index
    %c0_1 = arith.constant 0 : index
    %3 = vector.load %arg3[%c0, %c0_1] : memref<8x128xf32, #tpu.memory_space<vmem>>, vector<8x128xf32>
    %4 = vector.shape_cast %3 : vector<8x128xf32> to vector<1x8x128xf32>
    %5 = vector.shape_cast %4 : vector<1x8x128xf32> to vector<1x8x128xf32>
    %6 = vector.broadcast %5 : vector<1x8x128xf32> to vector<2x8x128xf32>
    %7 = vector.shape_cast %6 : vector<2x8x128xf32> to vector<16x128xf32>
    %c0_2 = arith.constant 0 : index
    %c0_3 = arith.constant 0 : index
    %8 = vector.load %arg2[%c0_2, %c0_3] : memref<16x128xf32, #tpu.memory_space<vmem>>, vector<16x128xf32>
    %9 = arith.subf %8, %7 : vector<16x128xf32>
    %c0_4 = arith.constant 0 : index
    %c0_5 = arith.constant 0 : index
    %10 = vector.load %arg4[%c0_4, %c0_5] : memref<8x128xf32, #tpu.memory_space<vmem>>, vector<8x128xf32>
    %11 = arith.mulf %9, %9 : vector<16x128xf32>
    %12 = math.absf %9 : vector<16x128xf32>
    %13 = arith.addf %11, %12 : vector<16x128xf32>
    %14 = vector.shape_cast %13 : vector<16x128xf32> to vector<2x8x128xf32>
    %cst = arith.constant dense<0.000000e+00> : vector<8x128xf32>
    %15 = vector.multi_reduction <add>, %14, %cst [0] : vector<2x8x128xf32> to vector<8x128xf32>
    %16 = arith.addf %10, %15 : vector<8x128xf32>
    %c0_6 = arith.constant 0 : index
    %c0_7 = arith.constant 0 : index
    %17 = vector.load %arg4[%c0_6, %c0_7] : memref<8x128xf32, #tpu.memory_space<vmem>>, vector<8x128xf32>
    tpu.vector_store %arg4[%c0_6, %c0_7], %16 {strides = array<i32>} : memref<8x128xf32, #tpu.memory_space<vmem>>, vector<8x128xf32>,
    return
  }
  func.func @transform_0(%arg0: i32, %arg1: i32) -> (i32, i32) {
    %c1_i32 = arith.constant 1 : i32
    %0 = arith.muli %arg0, %c1_i32 : i32
    %1 = arith.addi %0, %arg1 : i32
    %c0_i32 = arith.constant 0 : i32
    %2 = arith.minsi %1, %c0_i32 : i32
    %c0_i32_0 = arith.constant 0 : i32
    %c0_i32_1 = arith.constant 0 : i32
    return %2, %c0_i32_0 : i32, i32
  }
  func.func @transform_1(%arg0: i32, %arg1: i32) -> (i32, i32) {
    %c0_i32 = arith.constant 0 : i32
    %c0_i32_0 = arith.constant 0 : i32
    %c0_i32_1 = arith.constant 0 : i32
    return %c0_i32, %c0_i32_0 : i32, i32
  }
  func.func @transform_2(%arg0: i32, %arg1: i32) -> (i32, i32) {
    %c0_i32 = arith.constant 0 : i32
    %c0_i32_0 = arith.constant 0 : i32
    return %arg0, %c0_i32 : i32, i32
  }
}

</mosaic_0001>

<bundles_post_ra>
// kernel: tpu_custom_call.1
= control target key start
LH: loop header
LB: loop body
LE: loop exit
PB: predicated region body
PF: predicated region fallthrough
CT: control target
= control target key end

     0   :  { %7 = vsyncpa [#allocation3], 0  ;;  %s220_s0 = inlined_call_operand.hbm [shape: f32[16,128], index: 0, kind: input, shape index: {}]   ;;  %s221_s1 = inlined_call_operand.hbm [shape: f32[8,128], index: 1, kind: input, shape index: {}]   ;;  %s222_s2 = inlined_call_operand.hbm [shape: f32[8,128], index: 2, kind: output, shape index: {}]  }
   0x1   :  { %8 = vsyncpa [#allocation6], 0 }
   0x2   :  { %9 = vsyncpa [#allocation4], 0  ;;  %s164_s9 = smov [#allocation2]   ;;  %s92_s13 = scalar_lea.hbm %s220_s0, 256 }
   0x3   :  { %s21_s10 = sshll.u32 %s164_s9, 4  ;;  %p93_p0 = scmp.ne.s32.totalorder %s220_s0, %s92_s13  ;;  %s22_s10 = int_to_ptr.vmem [resolvable:$true] %s21_s10 }
   0x4   :  { %p96_p1 = scmp.lt.u32.totalorder %s92_s13, %s220_s0 }
   0x6   :  { %p98_p2 = pnand %p96_p1, %p93_p0 }
   0x8   :  { %101 = shalt.err (!%p98_p2)
}
   0x9   :  { %s102_s18 = scalar_lea.vmem %s22_s10, 256  ;;  %p107_p4 = scmp.lt.s32.totalorder %s22_s10, %s22_s10 }
   0xa   :  { %p103_p3 = scmp.ne.s32.totalorder %s22_s10, %s102_s18  ;;  %p108_p5 = scmp.lt.s32.totalorder %s102_s18, %s102_s18 }
   0xc   :  { %p109_p6 = por %p108_p5, %p107_p4 }
   0xe   :  { %p110_p7 = pnand %p109_p6, %p103_p3 }
  0x10   :  { %113 = shalt.err (!%p110_p7)
}
  0x11   :  { %s165_s19 = smov 128   ;;  %s166_s20 = smov 8  }
  0x12   :  { %27 = dma.hbm_to_vmem [thread:$0]  %s220_s0, 256, %s22_s10, [#allocation3], %s165_s19, %s165_s19, %s166_s20  }
  0x13   :  { %s167_s23 = smov [#allocation5]   ;;  %s114_s27 = scalar_lea.hbm %s221_s1, 128 }
  0x14   :  { %s34_s24 = sshll.u32 %s167_s23, 4  ;;  %p115_p8 = scmp.ne.s32.totalorder %s221_s1, %s114_s27  ;;  %s35_s24 = int_to_ptr.vmem [resolvable:$true] %s34_s24 }
  0x15   :  { %p118_p9 = scmp.lt.u32.totalorder %s114_s27, %s221_s1 }
  0x17   :  { %p120_p10 = pnand %p118_p9, %p115_p8 }
  0x19   :  { %123 = shalt.err (!%p120_p10)
}
  0x1a   :  { %s124_s4 = scalar_lea.vmem %s35_s24, 128  ;;  %p129_p12 = scmp.lt.s32.totalorder %s35_s24, %s35_s24 }
  0x1b   :  { %p125_p11 = scmp.ne.s32.totalorder %s35_s24, %s124_s4  ;;  %p130_p13 = scmp.lt.s32.totalorder %s124_s4, %s124_s4 }
  0x1d   :  { %p131_p0 = por %p130_p13, %p129_p12 }
  0x1f   :  { %p132_p1 = pnand %p131_p0, %p125_p11 }
  0x21   :  { %135 = shalt.err (!%p132_p1)
}
  0x22   :  { %37 = dma.hbm_to_vmem [thread:$0]  %s221_s1, 128, %s35_s24, [#allocation6]  }
  0x23   :  { %158 = dma.done.wait [#allocation3], 256  }
  0x24   :  { %159 = vsyncadd [#allocation3], 4294967040 }
  0x25   :  { %160 = dma.done.wait [#allocation6], 128  }
  0x26   :  { %161 = vsyncadd [#allocation6], 4294967168  ;;  %v53_v0 = vld [vmem:[#allocation5] sm:$0xff]  ;;  %v54_v1 = vld [vmem:[#allocation2] sm:$0xff]  ;;  %s168_s6 = smov [#allocation7]  }
  0x27   :  { %v55_v2 = vld [vmem:[#allocation2 + $0x8] sm:$0xff]  ;;  %v56_v3 = vsub.f32 %v54_v1, %v53_v0  ;;  %s74_s7 = sshll.u32 %s168_s6, 4  ;;  %s75_s7 = int_to_ptr.vmem [resolvable:$true] %s74_s7 }
  0x28   :  { %v57_v4 = vsub.f32 %v55_v2, %v53_v0  ;;  %s136_s1 = scalar_lea.vmem %s75_s7, 128  ;;  %p141_p3 = scmp.lt.s32.totalorder %s75_s7, %s75_s7 }
  0x29   :  { %v59_v5 = vmul.f32 %v56_v3, %v56_v3  ;;  %v61_v7 = vand.u32 2147483647, %v56_v3  ;;  %p137_p2 = scmp.ne.s32.totalorder %s75_s7, %s136_s1  ;;  %p142_p4 = scmp.lt.s32.totalorder %s136_s1, %s136_s1 }
  0x2a   :  { %v60_v6 = vmul.f32 %v57_v4, %v57_v4  ;;  %v62_v8 = vand.u32 2147483647, %v57_v4 }
  0x2b   :  { %v63_v9 = vadd.f32 %v61_v7, %v59_v5  ;;  %p143_p5 = por %p142_p4, %p141_p3 }
  0x2c   :  { %v64_v10 = vadd.f32 %v62_v8, %v60_v6 }
  0x2d   :  { %p144_p6 = pnand %p143_p5, %p137_p2 }
  0x2e   :  { %v65_v11 = vadd.f32 %v64_v10, %v63_v9 }
  0x30   :  { %67 = vst [vmem:[#allocation7] sm:$0xff] %v65_v11 }
  0x31   :  { %147 = shalt.err (!%p144_p6)
}
  0x32   :  { %s148_s10 = scalar_lea.hbm %s222_s2, 128 }
  0x33   :  { %p149_p7 = scmp.ne.s32.totalorder %s222_s2, %s148_s10  ;;  %p152_p8 = scmp.lt.u32.totalorder %s148_s10, %s222_s2 }
  0x35   :  { %p154_p9 = pnand %p152_p8, %p149_p7 }
  0x37   :  { %157 = shalt.err (!%p154_p9)
}
  0x38   :  { %77 = dma.vmem_to_hbm [thread:$0]  %s75_s7, 128, %s222_s2, [#allocation4]  }
  0x39   :  { %162 = dma.done.wait [#allocation4], 128  }
  0x3a   :  { %163 = vsyncadd [#allocation4], 4294967168 }
  0x3b   :  { %81 = vsyncpa [#allocation3], 1 }
  0x3c   :  { %82 = vsyncpa [#allocation6], 1 }
  0x3d   :  { %83 = vsyncpa [#allocation4], 1 }

</bundles_post_ra>
